<compile_context>
chip_gen: v7x
topology: tpu7x:2x2x1
jax: 0.10.0
libtpu: 0.0.40
codegen_flags: <defaults>
</compile_context>

<pallas_src>
import functools

import jax
import jax.numpy as jnp
from jax.experimental import pallas as pl
from jax.experimental.pallas import tpu as pltpu


def _round_up(x, m):
    return ((x + m - 1) // m) * m


def _matmul_kernel(x_ref, w_ref, o_ref):
    """One (tm, H) output slab per grid step; weight block is VMEM-resident."""
    o_ref[...] = jnp.dot(
        x_ref[...], w_ref[...], preferred_element_type=jnp.float32
    ).astype(o_ref.dtype)


def _pick_tm(M):
    """MXU-sized row tiles; keep >=2 parallel grid points when M allows so
    both v7x TensorCores get work."""
    if M >= 1024:
        return 512
    if M >= 256:
        return _round_up(pl.cdiv(M, 2), 8)
    return _round_up(M, 8)


@functools.partial(jax.jit, static_argnames=("tm", "use_bf16"))
def transformation_forward(input_embd, trans, *, tm=None, use_bf16=False):
    """input_embd: (M, H), trans: (H, H)  ->  (M, H) = input_embd @ trans."""
    M, K = input_embd.shape
    K2, N = trans.shape
    assert K == K2, "trans must be (H, H) matching input hidden dim"

    out_dtype = input_embd.dtype
    if use_bf16:
        # Optional MXU-native inputs with f32 accumulation (off by default to
        # preserve the module's f32 semantics exactly).
        input_embd = input_embd.astype(jnp.bfloat16)
        trans = trans.astype(jnp.bfloat16)

    if tm is None:
        tm = _pick_tm(M)

    # Pad rows so the grid tiles evenly (scSLAT cell counts are arbitrary).
    Mp = _round_up(M, tm)
    x = input_embd
    if Mp != M:
        x = jnp.pad(x, ((0, Mp - M), (0, 0)))

    grid = (Mp // tm,)

    # VMEM budget: resident weight + double-buffered x and output slabs.
    itemsize = jnp.dtype(x.dtype).itemsize
    out_itemsize = jnp.dtype(out_dtype).itemsize
    vmem_est = itemsize * (K * N + 2 * tm * K) + out_itemsize * 2 * tm * N + (1 << 20)
    cp_kwargs = {}
    if vmem_est > (32 << 20):
        # Only raise above the conservative scoped default when actually needed.
        # TODO(synk): for very large H (weight >~48 MiB) or v7x's 64 MiB VMEM,
        # fall back to a K-tiled accumulator kernel instead of a resident weight.
        cp_kwargs["vmem_limit_bytes"] = int(min(vmem_est, 100 << 20))

    out = pl.pallas_call(
        _matmul_kernel,
        out_shape=jax.ShapeDtypeStruct((Mp, N), out_dtype),
        grid_spec=pltpu.PrefetchScalarGridSpec(
            num_scalar_prefetch=0,
            grid=grid,
            in_specs=[
                pl.BlockSpec((tm, K), lambda i: (i, 0)),
                # Constant block index -> the (H, H) weight stays VMEM-resident
                # for the whole grid; no per-step HBM re-streaming.
                pl.BlockSpec((K, N), lambda i: (0, 0)),
            ],
            out_specs=pl.BlockSpec((tm, N), lambda i: (i, 0)),
        ),
        compiler_params=pltpu.CompilerParams(
            dimension_semantics=("parallel",), **cp_kwargs
        ),
    )(x, trans)

    if Mp != M:
        out = out[:M]
    return out


if __name__ == "__main__":
    HIDDEN = 256
    key = jax.random.PRNGKey(0)
    k1, k2, k3 = jax.random.split(key, 3)

    # Case 1: module as-initialized (trans = identity), small batch of embeddings.
    x1 = jax.random.normal(k1, (16, HIDDEN), dtype=jnp.float32)
    trans_eye = jnp.eye(HIDDEN, dtype=jnp.float32)
    out1 = jax.block_until_ready(transformation_forward(x1, trans_eye))
    assert out1.shape == (16, HIDDEN)
    assert jnp.allclose(out1, x1 @ trans_eye, atol=1e-5), "mismatch vs jnp reference"
    assert jnp.allclose(out1, x1, atol=1e-5), "identity transform mismatch"

    # Case 2: non-divisible row count (padding path) + perturbed (learned) trans.
    x2 = jax.random.normal(k2, (37, HIDDEN), dtype=jnp.float32)
    trans2 = trans_eye + 0.01 * jax.random.normal(
        k3, (HIDDEN, HIDDEN), dtype=jnp.float32
    )
    out2 = jax.block_until_ready(transformation_forward(x2, trans2))
    ref2 = x2 @ trans2
    assert out2.shape == (37, HIDDEN)
    assert jnp.allclose(out2, ref2, atol=1e-4, rtol=1e-4), "mismatch vs jnp reference"

    print("KERNEL_OK")
</pallas_src>

<mosaic_0001>
module attributes {stable_mosaic.version = 11 : i64} {
  func.func @_matmul_kernel(%arg0: i32, %arg1: memref<16x256xf32, #tpu.memory_space<vmem>>, %arg2: memref<256x256xf32, #tpu.memory_space<vmem>>, %arg3: memref<16x256xf32, #tpu.memory_space<vmem>>) attributes {dimension_semantics = [#tpu.dimension_semantics<parallel>], iteration_bounds = array<i64: 1>, scalar_prefetch = 0 : i64, scratch_operands = 0 : i64, tpu.core_type = #tpu.core_type<tc>, window_params = [{transform_indices = @transform_0, window_bounds = array<i64: 16, 256>}, {pipeline_mode = #tpu.pipeline_mode<synchronous>, transform_indices = @transform_1, window_bounds = array<i64: 256, 256>}, {transform_indices = @transform_2, window_bounds = array<i64: 16, 256>}]} {
    %c0 = arith.constant 0 : index
    %c0_0 = arith.constant 0 : index
    %0 = vector.load %arg1[%c0, %c0_0] : memref<16x256xf32, #tpu.memory_space<vmem>>, vector<16x256xf32>
    %c0_1 = arith.constant 0 : index
    %c0_2 = arith.constant 0 : index
    %1 = vector.load %arg2[%c0_1, %c0_2] : memref<256x256xf32, #tpu.memory_space<vmem>>, vector<256x256xf32>
    %cst = arith.constant dense<0.000000e+00> : vector<16x256xf32>
    %2 = tpu.matmul %0, %1, %cst {dimension_numbers = #tpu.dot_dimension_numbers<[1], [0], [0], [1], [0, 0, 1, 1], [], []>} : vector<16x256xf32>, vector<256x256xf32>, vector<16x256xf32> -> vector<16x256xf32>
    %c0_3 = arith.constant 0 : index
    %c0_4 = arith.constant 0 : index
    %3 = vector.load %arg3[%c0_3, %c0_4] : memref<16x256xf32, #tpu.memory_space<vmem>>, vector<16x256xf32>
    tpu.vector_store %arg3[%c0_3, %c0_4], %2 {strides = array<i32>} : memref<16x256xf32, #tpu.memory_space<vmem>>, vector<16x256xf32>,
    return
  }
  func.func @transform_0(%arg0: i32) -> (i32, i32) {
    %c0_i32 = arith.constant 0 : i32
    %c0_i32_0 = arith.constant 0 : i32
    return %arg0, %c0_i32 : i32, i32
  }
  func.func @transform_1(%arg0: i32) -> (i32, i32) {
    %c0_i32 = arith.constant 0 : i32
    %c0_i32_0 = arith.constant 0 : i32
    %c0_i32_1 = arith.constant 0 : i32
    return %c0_i32, %c0_i32_0 : i32, i32
  }
  func.func @transform_2(%arg0: i32) -> (i32, i32) {
    %c0_i32 = arith.constant 0 : i32
    %c0_i32_0 = arith.constant 0 : i32
    return %arg0, %c0_i32 : i32, i32
  }
}

</mosaic_0001>

<bundles_post_ra>
// kernel: transformation_forward.1
= control target key start
LH: loop header
LB: loop body
LE: loop exit
PB: predicated region body
PF: predicated region fallthrough
CT: control target
= control target key end

     0   :  { %7 = vsyncpa [#allocation3], 0  ;;  %s445_s0 = inlined_call_operand.hbm [shape: f32[16,256], index: 0, kind: input, shape index: {}]   ;;  %s446_s1 = inlined_call_operand.hbm [shape: f32[256,256], index: 1, kind: input, shape index: {}]   ;;  %s447_s2 = inlined_call_operand.hbm [shape: f32[16,256], index: 2, kind: output, shape index: {}]  }
   0x1   :  { %8 = vsyncpa [#allocation6], 0 }
   0x2   :  { %9 = vsyncpa [#allocation4], 0  ;;  %s380_s9 = smov [#allocation2]   ;;  %s308_s13 = scalar_lea.hbm %s445_s0, 512 }
   0x3   :  { %s15_s10 = sshll.u32 %s380_s9, 4  ;;  %p309_p0 = scmp.ne.s32.totalorder %s445_s0, %s308_s13  ;;  %s16_s10 = int_to_ptr.vmem [resolvable:$true] %s15_s10 }
   0x4   :  { %p312_p1 = scmp.lt.u32.totalorder %s308_s13, %s445_s0 }
   0x6   :  { %p314_p2 = pnand %p312_p1, %p309_p0 }
   0x8   :  { %317 = shalt.err (!%p314_p2)
}
   0x9   :  { %s318_s18 = scalar_lea.vmem %s16_s10, 512  ;;  %p323_p4 = scmp.lt.s32.totalorder %s16_s10, %s16_s10 }
   0xa   :  { %p319_p3 = scmp.ne.s32.totalorder %s16_s10, %s318_s18  ;;  %p324_p5 = scmp.lt.s32.totalorder %s318_s18, %s318_s18 }
   0xc   :  { %p325_p6 = por %p324_p5, %p323_p4 }
   0xe   :  { %p326_p7 = pnand %p325_p6, %p319_p3 }
  0x10   :  { %329 = shalt.err (!%p326_p7)
}
  0x11   :  { %s381_s19 = smov 256   ;;  %s382_s20 = smov 16  }
  0x12   :  { %21 = dma.hbm_to_vmem [thread:$0]  %s445_s0, 512, %s16_s10, [#allocation3], %s381_s19, %s381_s19, %s382_s20  }
  0x13   :  { %s383_s23 = smov [#allocation5]   ;;  %s330_s27 = scalar_lea.hbm %s446_s1, 8192 }
  0x14   :  { %s27_s24 = sshll.u32 %s383_s23, 4  ;;  %p331_p8 = scmp.ne.s32.totalorder %s446_s1, %s330_s27  ;;  %s28_s24 = int_to_ptr.vmem [resolvable:$true] %s27_s24 }
  0x15   :  { %p334_p9 = scmp.lt.u32.totalorder %s330_s27, %s446_s1 }
  0x17   :  { %p336_p10 = pnand %p334_p9, %p331_p8 }
  0x19   :  { %339 = shalt.err (!%p336_p10)
}
  0x1a   :  { %s340_s4 = scalar_lea.vmem %s28_s24, 8192  ;;  %p345_p12 = scmp.lt.s32.totalorder %s28_s24, %s28_s24 }
  0x1b   :  { %p341_p11 = scmp.ne.s32.totalorder %s28_s24, %s340_s4  ;;  %p346_p13 = scmp.lt.s32.totalorder %s340_s4, %s340_s4 }
  0x1d   :  { %p347_p0 = por %p346_p13, %p345_p12 }
  0x1f   :  { %p348_p1 = pnand %p347_p0, %p341_p11 }
  0x21   :  { %351 = shalt.err (!%p348_p1)
}
  0x22   :  { %33 = dma.hbm_to_vmem [thread:$0]  %s446_s1, 8192, %s28_s24, [#allocation6], %s381_s19, %s381_s19, %s382_s20  }
  0x23   :  { %374 = dma.done.wait [#allocation3], 512  }
  0x24   :  { %375 = vsyncadd [#allocation3], 4294966784 }
  0x25   :  { %376 = dma.done.wait [#allocation6], 8192  }
  0x26   :  { %377 = vsyncadd [#allocation6], 4294959104  ;;  %v45_v0 = vld [vmem:[#allocation5 + $0x8] sm:$0xff]  ;;  %v47_v1 = vld [vmem:[#allocation5 + $0x18] sm:$0xff]  ;;  %s384_s1 = smov [#allocation7]  }
  0x27   :  { %v44_v2 = vld [vmem:[#allocation5] sm:$0xff]  ;;  %v207_v3 = vpack.c.bf16 %v47_v1, %v45_v0  ;;  %v46_v4 = vld [vmem:[#allocation5 + $0x10] sm:$0xff]  ;;  %v49_v5 = vld [vmem:[#allocation5 + $0x28] sm:$0xff]  ;;  %s194_s6 = sshll.u32 %s384_s1, 4  ;;  %s195_s6 = int_to_ptr.vmem [resolvable:$true] %s194_s6 }
  0x28   :  { %v51_v6 = vld [vmem:[#allocation5 + $0x38] sm:$0xff]  ;;  %v209_v7 = vpack.c.bf16 %v46_v4, %v44_v2  ;;  %v48_v9 = vld [vmem:[#allocation5 + $0x20] sm:$0xff]  ;;  %v50_v10 = vld [vmem:[#allocation5 + $0x30] sm:$0xff]  ;;  %s352_s7 = scalar_lea.vmem %s195_s6, 512  ;;  %p357_p3 = scmp.lt.s32.totalorder %s195_s6, %s195_s6 }
  0x29   :  { %v211_v8 = vpack.c.bf16 %v51_v6, %v49_v5  ;;  %v53_v11 = vld [vmem:[#allocation5 + $0x48] sm:$0xff]  ;;  %208 = vmatprep.subr.bf16.mxu0 %v207_v3  ;;  %271 = vmatprep.subr.bf16.mxu1 %v207_v3  ;;  %v55_v12 = vld [vmem:[#allocation5 + $0x58] sm:$0xff]  ;;  %v213_v13 = vpack.c.bf16 %v50_v10, %v48_v9  ;;  %v52_v15 = vld [vmem:[#allocation5 + $0x40] sm:$0xff]  ;;  %p353_p2 = scmp.ne.s32.totalorder %s195_s6, %s352_s7  ;;  %p358_p4 = scmp.lt.s32.totalorder %s352_s7, %s352_s7 }
  0x2a   :  { %210 = vmatpush1.bf16.msra.mxu0 %v209_v7  ;;  %287 = vmatpush1.bf16.msra.mxu1 %v209_v7  ;;  %v215_v14 = vpack.c.bf16 %v55_v12, %v53_v11  ;;  %v54_v16 = vld [vmem:[#allocation5 + $0x50] sm:$0xff]  ;;  %v57_v17 = vld [vmem:[#allocation5 + $0x68] sm:$0xff]  ;;  %v59_v18 = vld [vmem:[#allocation5 + $0x78] sm:$0xff] }
  0x2b   :  { %212 = vmatprep.subr.bf16.mxu0 %v211_v8  ;;  %272 = vmatprep.subr.bf16.mxu1 %v211_v8  ;;  %v217_v19 = vpack.c.bf16 %v54_v16, %v52_v15  ;;  %v219_v20 = vpack.c.bf16 %v59_v18, %v57_v17  ;;  %v56_v21 = vld [vmem:[#allocation5 + $0x60] sm:$0xff]  ;;  %v58_v22 = vld [vmem:[#allocation5 + $0x70] sm:$0xff]  ;;  %v61_v23 = vld [vmem:[#allocation5 + $0x88] sm:$0xff]  ;;  %p359_p5 = por %p358_p4, %p357_p3 }
  0x2c   :  { %v63_v24 = vld [vmem:[#allocation5 + $0x98] sm:$0xff]  ;;  %v221_v25 = vpack.c.bf16 %v58_v22, %v56_v21  ;;  %v60_v27 = vld [vmem:[#allocation5 + $0x80] sm:$0xff]  ;;  %v62_v28 = vld [vmem:[#allocation5 + $0x90] sm:$0xff] }
  0x2d   :  { %v223_v26 = vpack.c.bf16 %v63_v24, %v61_v23  ;;  %v65_v29 = vld [vmem:[#allocation5 + $0xa8] sm:$0xff]  ;;  %v67_v30 = vld [vmem:[#allocation5 + $0xb8] sm:$0xff]  ;;  %v225_v31 = vpack.c.bf16 %v62_v28, %v60_v27  ;;  %v64_v33 = vld [vmem:[#allocation5 + $0xa0] sm:$0xff]  ;;  %p360_p6 = pnand %p359_p5, %p353_p2 }
  0x2e   :  { %214 = vmatpush1.bf16.msra.mxu0 %v213_v13  ;;  %288 = vmatpush1.bf16.msra.mxu1 %v213_v13  ;;  %v227_v32 = vpack.c.bf16 %v67_v30, %v65_v29  ;;  %v66_v34 = vld [vmem:[#allocation5 + $0xb0] sm:$0xff]  ;;  %v69_v35 = vld [vmem:[#allocation5 + $0xc8] sm:$0xff]  ;;  %v71_v36 = vld [vmem:[#allocation5 + $0xd8] sm:$0xff] }
  0x2f   :  { %216 = vmatprep.subr.bf16.mxu0 %v215_v14  ;;  %273 = vmatprep.subr.bf16.mxu1 %v215_v14  ;;  %v229_v37 = vpack.c.bf16 %v66_v34, %v64_v33  ;;  %v68_v38 = vld [vmem:[#allocation5 + $0xc0] sm:$0xff]  ;;  %v231_v39 = vpack.c.bf16 %v71_v36, %v69_v35  ;;  %v70_v40 = vld [vmem:[#allocation5 + $0xd0] sm:$0xff]  ;;  %v41_v41 = vld [vmem:[#allocation2 + $0x8] sm:$0xff] }
  0x30   :  { %v43_v42 = vld [vmem:[#allocation2 + $0x18] sm:$0xff]  ;;  %v73_v43 = vld [vmem:[#allocation5 + $0xe8] sm:$0xff]  ;;  %172 = vmatprep.mubr.f32.mxu0 %v41_v41  ;;  %v233_v45 = vpack.c.bf16 %v70_v40, %v68_v38  ;;  %v72_v47 = vld [vmem:[#allocation5 + $0xe0] sm:$0xff] }
  0x31   :  { %v75_v44 = vld [vmem:[#allocation5 + $0xf8] sm:$0xff]  ;;  %178 = vmatprep.mubr.f32.mxu1 %v43_v42  ;;  %v74_v48 = vld [vmem:[#allocation5 + $0xf0] sm:$0xff]  ;;  %v77_v49 = vld [vmem:[#allocation5 + $0x108] sm:$0xff] }
  0x32   :  { %218 = vmatpush1.bf16.msra.mxu0 %v217_v19  ;;  %289 = vmatpush1.bf16.msra.mxu1 %v217_v19  ;;  %v235_v46 = vpack.c.bf16 %v75_v44, %v73_v43  ;;  %v79_v50 = vld [vmem:[#allocation5 + $0x118] sm:$0xff]  ;;  %v237_v51 = vpack.c.bf16 %v74_v48, %v72_v47  ;;  %v76_v53 = vld [vmem:[#allocation5 + $0x100] sm:$0xff]  ;;  %v78_v54 = vld [vmem:[#allocation5 + $0x110] sm:$0xff] }
  0x33   :  { %220 = vmatprep.subr.bf16.mxu0 %v219_v20  ;;  %274 = vmatprep.subr.bf16.mxu1 %v219_v20  ;;  %v239_v52 = vpack.c.bf16 %v79_v50, %v77_v49  ;;  %v81_v55 = vld [vmem:[#allocation5 + $0x128] sm:$0xff]  ;;  %v83_v56 = vld [vmem:[#allocation5 + $0x138] sm:$0xff]  ;;  %v241_v57 = vpack.c.bf16 %v78_v54, %v76_v53  ;;  %v80_v59 = vld [vmem:[#allocation5 + $0x120] sm:$0xff] }
  0x34   :  { %v243_v58 = vpack.c.bf16 %v83_v56, %v81_v55  ;;  %v82_v60 = vld [vmem:[#allocation5 + $0x130] sm:$0xff]  ;;  %v85_v61 = vld [vmem:[#allocation5 + $0x148] sm:$0xff]  ;;  %v87_v62 = vld [vmem:[#allocation5 + $0x158] sm:$0xff] }
  0x35   :  { %v245_v63 = vpack.c.bf16 %v82_v60, %v80_v59  ;;  %v247_v0 = vpack.c.bf16 %v87_v62, %v85_v61  ;;  %v84_v1 = vld [vmem:[#allocation5 + $0x140] sm:$0xff]  ;;  %v86_v2 = vld [vmem:[#allocation5 + $0x150] sm:$0xff]  ;;  %v89_v3 = vld [vmem:[#allocation5 + $0x168] sm:$0xff] }
  0x36   :  { %222 = vmatpush1.bf16.msra.mxu0 %v221_v25  ;;  %290 = vmatpush1.bf16.msra.mxu1 %v221_v25  ;;  %v91_v4 = vld [vmem:[#allocation5 + $0x178] sm:$0xff]  ;;  %v249_v5 = vpack.c.bf16 %v86_v2, %v84_v1  ;;  %v88_v7 = vld [vmem:[#allocation5 + $0x160] sm:$0xff]  ;;  %v90_v8 = vld [vmem:[#allocation5 + $0x170] sm:$0xff] }
  0x37   :  { %224 = vmatprep.subr.bf16.mxu0 %v223_v26  ;;  %275 = vmatprep.subr.bf16.mxu1 %v223_v26  ;;  %v251_v6 = vpack.c.bf16 %v91_v4, %v89_v3  ;;  %v93_v9 = vld [vmem:[#allocation5 + $0x188] sm:$0xff]  ;;  %v95_v10 = vld [vmem:[#allocation5 + $0x198] sm:$0xff]  ;;  %v253_v11 = vpack.c.bf16 %v90_v8, %v88_v7  ;;  %v92_v13 = vld [vmem:[#allocation5 + $0x180] sm:$0xff] }
  0x38   :  { %v255_v12 = vpack.c.bf16 %v95_v10, %v93_v9  ;;  %v94_v14 = vld [vmem:[#allocation5 + $0x190] sm:$0xff]  ;;  %v97_v15 = vld [vmem:[#allocation5 + $0x1a8] sm:$0xff]  ;;  %v99_v16 = vld [vmem:[#allocation5 + $0x1b8] sm:$0xff] }
  0x39   :  { %v257_v17 = vpack.c.bf16 %v94_v14, %v92_v13  ;;  %v259_v18 = vpack.c.bf16 %v99_v16, %v97_v15  ;;  %v96_v19 = vld [vmem:[#allocation5 + $0x1a0] sm:$0xff]  ;;  %v98_v20 = vld [vmem:[#allocation5 + $0x1b0] sm:$0xff]  ;;  %v101_v21 = vld [vmem:[#allocation5 + $0x1c8] sm:$0xff] }
  0x3a   :  { %226 = vmatpush1.bf16.msra.mxu0 %v225_v31  ;;  %291 = vmatpush1.bf16.msra.mxu1 %v225_v31  ;;  %v103_v22 = vld [vmem:[#allocation5 + $0x1d8] sm:$0xff]  ;;  %v261_v23 = vpack.c.bf16 %v98_v20, %v96_v19  ;;  %v100_v25 = vld [vmem:[#allocation5 + $0x1c0] sm:$0xff]  ;;  %v102_v26 = vld [vmem:[#allocation5 + $0x1d0] sm:$0xff] }
  0x3b   :  { %228 = vmatprep.subr.bf16.mxu0 %v227_v32  ;;  %276 = vmatprep.subr.bf16.mxu1 %v227_v32  ;;  %v263_v24 = vpack.c.bf16 %v103_v22, %v101_v21  ;;  %v105_v27 = vld [vmem:[#allocation5 + $0x1e8] sm:$0xff]  ;;  %v107_v28 = vld [vmem:[#allocation5 + $0x1f8] sm:$0xff]  ;;  %v265_v29 = vpack.c.bf16 %v102_v26, %v100_v25  ;;  %v104_v31 = vld [vmem:[#allocation5 + $0x1e0] sm:$0xff] }
  0x3c   :  { %v267_v30 = vpack.c.bf16 %v107_v28, %v105_v27  ;;  %v106_v32 = vld [vmem:[#allocation5 + $0x1f0] sm:$0xff]  ;;  %v40_v34 = vld [vmem:[#allocation2] sm:$0xff] }
  0x3d   :  { %v269_v33 = vpack.c.bf16 %v106_v32, %v104_v31  ;;  %v42_v35 = vld [vmem:[#allocation2 + $0x10] sm:$0xff] }
  0x3e   :  { %230 = vmatpush1.bf16.msra.mxu0 %v229_v37  ;;  %292 = vmatpush1.bf16.msra.mxu1 %v229_v37 }
  0x3f   :  { %232 = vmatprep.subr.bf16.mxu0 %v231_v39  ;;  %277 = vmatprep.subr.bf16.mxu1 %v231_v39 }
  0x42   :  { %234 = vmatpush1.bf16.msra.mxu0 %v233_v45  ;;  %293 = vmatpush1.bf16.msra.mxu1 %v233_v45 }
  0x43   :  { %236 = vmatprep.subr.bf16.mxu0 %v235_v46  ;;  %278 = vmatprep.subr.bf16.mxu1 %v235_v46 }
  0x46   :  { %238 = vmatpush1.bf16.msra.mxu0 %v237_v51  ;;  %294 = vmatpush1.bf16.msra.mxu1 %v237_v51 }
  0x47   :  { %240 = vmatprep.subr.bf16.mxu0 %v239_v52  ;;  %279 = vmatprep.subr.bf16.mxu1 %v239_v52 }
  0x4a   :  { %242 = vmatpush1.bf16.msra.mxu0 %v241_v57  ;;  %295 = vmatpush1.bf16.msra.mxu1 %v241_v57 }
  0x4b   :  { %244 = vmatprep.subr.bf16.mxu0 %v243_v58  ;;  %280 = vmatprep.subr.bf16.mxu1 %v243_v58 }
  0x4e   :  { %246 = vmatpush1.bf16.msra.mxu0 %v245_v63  ;;  %296 = vmatpush1.bf16.msra.mxu1 %v245_v63 }
  0x4f   :  { %248 = vmatprep.subr.bf16.mxu0 %v247_v0  ;;  %281 = vmatprep.subr.bf16.mxu1 %v247_v0 }
  0x52   :  { %250 = vmatpush1.bf16.msra.mxu0 %v249_v5  ;;  %297 = vmatpush1.bf16.msra.mxu1 %v249_v5 }
  0x53   :  { %252 = vmatprep.subr.bf16.mxu0 %v251_v6  ;;  %282 = vmatprep.subr.bf16.mxu1 %v251_v6 }
  0x56   :  { %254 = vmatpush1.bf16.msra.mxu0 %v253_v11  ;;  %298 = vmatpush1.bf16.msra.mxu1 %v253_v11 }
  0x57   :  { %256 = vmatprep.subr.bf16.mxu0 %v255_v12  ;;  %283 = vmatprep.subr.bf16.mxu1 %v255_v12 }
  0x5a   :  { %258 = vmatpush1.bf16.msra.mxu0 %v257_v17  ;;  %299 = vmatpush1.bf16.msra.mxu1 %v257_v17 }
  0x5b   :  { %260 = vmatprep.subr.bf16.mxu0 %v259_v18  ;;  %284 = vmatprep.subr.bf16.mxu1 %v259_v18 }
  0x5e   :  { %262 = vmatpush1.bf16.msra.mxu0 %v261_v23  ;;  %300 = vmatpush1.bf16.msra.mxu1 %v261_v23 }
  0x5f   :  { %264 = vmatprep.subr.bf16.mxu0 %v263_v24  ;;  %285 = vmatprep.subr.bf16.mxu1 %v263_v24 }
  0x62   :  { %266 = vmatpush1.bf16.msra.mxu0 %v265_v29  ;;  %301 = vmatpush1.bf16.msra.mxu1 %v265_v29 }
  0x63   :  { %268 = vmatprep.subr.bf16.mxu0 %v267_v30  ;;  %286 = vmatprep.subr.bf16.mxu1 %v267_v30 }
  0x66   :  { %270 = vmatpush1.bf16.msra.mxu0 %v269_v33  ;;  %302 = vmatpush1.bf16.msra.mxu1 %v269_v33 }
  0x69   :  { %173 = vmatmul.mubr.f32.vlgmr.msra.gmra.mrb[0].mxu0 %v40_v34  ;;  %179 = vmatmul.mubr.f32.vlgmr.msra.gmra.mrb[0].mxu1 %v42_v35 }
 0x13c   :  { %v174_v36 = vpop.f32.mrb[0].mxu0  ;;  %v180_v37 = vpop.f32.mrb[0].mxu1 }
 0x13d   :  { %185 = vst [vmem:[#allocation7] sm:$0xff] %v174_v36  ;;  %187 = vst [vmem:[#allocation7 + $0x10] sm:$0xff] %v180_v37  ;;  %v176_v38 = vpop.f32.mrb[1].mxu0  ;;  %v182_v39 = vpop.f32.mrb[1].mxu1 }
 0x13e   :  { %186 = vst [vmem:[#allocation7 + $0x8] sm:$0xff] %v176_v38  ;;  %188 = vst [vmem:[#allocation7 + $0x18] sm:$0xff] %v182_v39 }
 0x13f   :  { %363 = shalt.err (!%p360_p6)
}
 0x140   :  { %s364_s10 = scalar_lea.hbm %s447_s2, 512 }
 0x141   :  { %p365_p7 = scmp.ne.s32.totalorder %s447_s2, %s364_s10  ;;  %p368_p8 = scmp.lt.u32.totalorder %s364_s10, %s447_s2 }
 0x143   :  { %p370_p9 = pnand %p368_p8, %p365_p7 }
 0x145   :  { %373 = shalt.err (!%p370_p9)
}
 0x146   :  { %200 = dma.vmem_to_hbm [thread:$0]  %s195_s6, 512, %s447_s2, [#allocation4], %s381_s19, %s381_s19, %s382_s20  }
 0x147   :  { %378 = dma.done.wait [#allocation4], 512  }
 0x148   :  { %379 = vsyncadd [#allocation4], 4294966784 }
 0x149   :  { %204 = vsyncpa [#allocation3], 1 }
 0x14a   :  { %205 = vsyncpa [#allocation6], 1 }
 0x14b   :  { %206 = vsyncpa [#allocation4], 1 }

</bundles_post_ra>
